<compile_context>
chip_gen: v7x
topology: tpu7x:2x2x1
jax: 0.10.0
libtpu: 0.0.40
codegen_flags: <defaults>
</compile_context>

<pallas_src>
import functools

import numpy as np
import jax
import jax.numpy as jnp
from jax.experimental import pallas as pl
from jax.experimental.pallas import tpu as pltpu


def _convnormpool_kernel(x_ref, w1_ref, g1_ref, b1_ref,
                         w2_ref, g2_ref, b2_ref,
                         w3_ref, g3_ref, b3_ref,
                         out_ref, pool_ref, *, n_batch):
    Cin, NL = x_ref.shape
    H, KC = w1_ref.shape
    K = KC // Cin
    N = n_batch
    L = NL // N               # per-batch frame length (== input length)
    L1 = L - K + 1            # valid-conv output length per batch
    P = L // 2                # pooled length per batch
    eps = 1e-5

    # Valid-column mask: inside each per-batch length-L segment of the folded lane axis,
    # columns t < K-1 are the causal-pad / don't-care region.
    lane = jax.lax.broadcasted_iota(jnp.int32, (1, NL), 1)
    valid = (lane % L) >= (K - 1)                       # (1, N*L)
    inv_cnt = 1.0 / float(N * L1)

    def shift_right(frame, s):
        # Logical right-shift by s lanes with zero fill.  Columns that pick up the previous
        # batch's tail land only in masked (t < K-1) positions, so nothing leaks across
        # batches once the mask is applied.
        if s == 0:
            return frame
        pad = jnp.zeros((frame.shape[0], s), frame.dtype)
        return jnp.concatenate([pad, frame[:, :NL - s]], axis=1)

    def causal_conv(frame, w_ref):
        # frame: (C, N*L) activation frame (pad columns already zero); w_ref: (H, K*C) with
        # k-major / c-minor rows.  One fused im2col matmul per layer, no broadcast weights.
        # NOTE: at non-toy sizes cast both operands to bf16 (keep preferred_element_type=f32)
        # for MXU peak on v6e/v7x; on v7x (64 MiB VMEM) the K*C-row cols buffer can instead be
        # avoided with K per-tap accumulating matmuls W_k (H, C) @ shift_right(frame, K-1-k).
        cols = jnp.concatenate([shift_right(frame, K - 1 - k) for k in range(K)], axis=0)
        return jnp.dot(w_ref[...], cols, preferred_element_type=jnp.float32)

    def bn_swish(v, g_ref, b_ref):
        # Training-mode BatchNorm1d: per-channel stats over the N*L1 valid columns, folded
        # into one scale/shift; two-pass variance avoids E[x^2]-E[x]^2 cancellation.
        mean = jnp.sum(jnp.where(valid, v, 0.0), axis=1, keepdims=True) * inv_cnt
        d = jnp.where(valid, v - mean, 0.0)
        var = jnp.sum(d * d, axis=1, keepdims=True) * inv_cnt
        scale = g_ref[...] * jax.lax.rsqrt(var + eps)
        shift = b_ref[...] - mean * scale
        y = v * scale + shift
        # Swish: x * sigmoid(x); the divide sits on the EUP slot via the approx reciprocal.
        # (If the EUP slot ever binds on v5e, 0.5*(tanh(0.5*y)+1) halves EUP traffic.)
        return y * pl.reciprocal(1.0 + jnp.exp(-y), approx=True)

    x = x_ref[...].astype(jnp.float32)

    # ---- layer 1 (keep the raw conv output for the skip connection) ---------------------------
    conv1 = causal_conv(x, w1_ref)                                    # (H, N*L)
    a1 = jnp.where(valid, bn_swish(conv1, g1_ref, b1_ref), 0.0)

    # ---- layer 2 -------------------------------------------------------------------------------
    conv2 = causal_conv(a1, w2_ref)
    a2 = jnp.where(valid, bn_swish(conv2, g2_ref, b2_ref), 0.0)

    # ---- layer 3 + skip: conv1 is already in the same (H, N*L) layout, so the skip is an add --
    conv3 = causal_conv(a2, w3_ref)
    f = jnp.where(valid, bn_swish(conv1 + conv3, g3_ref, b3_ref), 0.0)   # padded pre-pool frame

    # ---- MaxPool1d(kernel_size=2): pooling partners sit in adjacent lanes ---------------------
    # Deinterleave with one XLU transpose + sublane-strided reads of a small scratch, then
    # transpose back so the output stores stay lane-dense.  (A stride-2 lane slice or a
    # lane-splitting reshape would drop the transpose where Mosaic supports it.)
    pool_ref[...] = jnp.transpose(f)                                  # (N*L, H)
    ev = pool_ref[pl.ds(0, N * P, stride=2), :]
    od = pool_ref[pl.ds(1, N * P, stride=2), :]
    pooled = jnp.transpose(jnp.maximum(ev, od))                       # (H, N*P), lane-dense

    # Emit (N, H, P) with pooled time on lanes; the static per-batch slices below are subsumed
    # by a batch-tiled grid at non-toy sizes.
    for n in range(N):
        out_ref[n] = pooled[:, n * P:(n + 1) * P]


def _vmem_limit_bytes(default=32 * 1024 * 1024):
    # Generation-aware scoped-VMEM budget: ~half of physical VMEM (64 MiB on v7x vs 128 MiB on
    # v5e/v6e), capped so headroom remains for double-buffering once the kernel is gridded.
    try:
        return int(min(pltpu.get_tpu_info().vmem_capacity_bytes // 2, 64 * 1024 * 1024))
    except Exception:
        return default


def convnormpool_forward(x_ncl, params):
    """x_ncl: (N, C_in, L) as in PyTorch.  Returns (N, H, L // 2) as in PyTorch.

    params = (w1, b1, g1, be1, w2, b2, g2, be2, w3, b3, g3, be3) with PyTorch shapes.
    Conv biases are accepted but not sent to the kernel: every conv feeds a training-mode
    BatchNorm whose mean subtraction cancels per-channel constants exactly.
    """
    (w1, _b1, g1, be1, w2, _b2, g2, be2, w3, _b3, g3, be3) = params
    N, Cin, L = x_ncl.shape
    H, _, K = w1.shape
    P = L // 2
    assert L % 2 == 0, "pooling path assumes an even sequence length"

    def wcol(w):
        # (H, C, K) -> (H, K*C), k-major / c-minor, matching the kernel's cols row order.
        Hh, Cc, Kk = w.shape
        return jnp.transpose(w, (0, 2, 1)).reshape(Hh, Kk * Cc).astype(jnp.float32)

    def cvec(v):   # per-channel vector broadcasting against (H, N*L)
        return jnp.asarray(v, jnp.float32).reshape(-1, 1)

    # Fold (N, C, L) -> (C, N*L): channels outer, batch-major time on the lane axis.
    x2d = jnp.transpose(x_ncl.astype(jnp.float32), (1, 0, 2)).reshape(Cin, N * L)

    vmem = pl.BlockSpec(memory_space=pltpu.MemorySpace.VMEM)
    kernel = functools.partial(_convnormpool_kernel, n_batch=N)

    return pl.pallas_call(
        kernel,
        out_shape=jax.ShapeDtypeStruct((N, H, P), jnp.float32),
        in_specs=[vmem] * 10,
        out_specs=vmem,
        scratch_shapes=[pltpu.VMEM((N * L, H), jnp.float32)],   # transposed pooling staging
        compiler_params=pltpu.CompilerParams(vmem_limit_bytes=_vmem_limit_bytes()),
    )(x2d,
      wcol(w1), cvec(g1), cvec(be1),
      wcol(w2), cvec(g2), cvec(be2),
      wcol(w3), cvec(g3), cvec(be3))


def _ref_forward_np(x, w1, b1, w2, b2, w3, b3, K):
    """float64 numpy reference mirroring the PyTorch module (training-mode BN, gamma=1, beta=0)."""
    x = np.asarray(x, np.float64)
    w1, w2, w3 = (np.asarray(w, np.float64) for w in (w1, w2, w3))
    b1, b2, b3 = (np.asarray(b, np.float64) for b in (b1, b2, b3))

    def conv1d(v, w, b):
        Nn, Cc, Ll = v.shape
        Kk = w.shape[2]
        Lout = Ll - Kk + 1
        out = np.zeros((Nn, w.shape[0], Lout))
        for dk in range(Kk):
            out += np.einsum('ncl,oc->nol', v[:, :, dk:dk + Lout], w[:, :, dk])
        return out + b[None, :, None]

    def bn(v, eps=1e-5):
        m = v.mean(axis=(0, 2), keepdims=True)
        var = ((v - m) ** 2).mean(axis=(0, 2), keepdims=True)
        return (v - m) / np.sqrt(var + eps)

    def swish(v):
        return v / (1.0 + np.exp(-v))

    def pad(v):
        return np.pad(v, ((0, 0), (0, 0), (K - 1, 0)))

    conv1 = conv1d(x, w1, b1)
    h = pad(swish(bn(conv1)))
    h = conv1d(h, w2, b2)
    h = pad(swish(bn(h)))
    conv3 = conv1d(h, w3, b3)
    h = pad(swish(bn(conv1 + conv3)))
    Nn, Hh, Lpp = h.shape
    Pp = Lpp // 2
    return h[:, :, :2 * Pp].reshape(Nn, Hh, Pp, 2).max(axis=-1)


if __name__ == "__main__":
    # Small shapes consistent with ConvNormPool(input_size=4, hidden_size=8, kernel_size=3)
    N, Cin, L = 2, 4, 16
    H, K = 8, 3

    key = jax.random.PRNGKey(0)
    ks = jax.random.split(key, 8)
    w1 = jax.random.normal(ks[0], (H, Cin, K), jnp.float32) * 0.3
    b1 = jax.random.normal(ks[1], (H,), jnp.float32) * 0.1
    w2 = jax.random.normal(ks[2], (H, H, K), jnp.float32) * 0.3
    b2 = jax.random.normal(ks[3], (H,), jnp.float32) * 0.1
    w3 = jax.random.normal(ks[4], (H, H, K), jnp.float32) * 0.3
    b3 = jax.random.normal(ks[5], (H,), jnp.float32) * 0.1
    # BatchNorm1d default parameter init (weight=1, bias=0); forward uses batch statistics
    # exactly as a freshly-constructed PyTorch module in training mode would.
    g1 = g2 = g3 = jnp.ones((H,), jnp.float32)
    be1 = be2 = be3 = jnp.zeros((H,), jnp.float32)
    # TODO(synk): BatchNorm running-mean/var buffer updates (a training side effect) are not modeled.

    x = jax.random.normal(ks[6], (N, Cin, L), jnp.float32)

    params = (w1, b1, g1, be1, w2, b2, g2, be2, w3, b3, g3, be3)
    out = convnormpool_forward(x, params)
    out = jax.block_until_ready(out)

    assert out.shape == (N, H, L // 2), out.shape

    ref = _ref_forward_np(np.asarray(x), np.asarray(w1), np.asarray(b1),
                          np.asarray(w2), np.asarray(b2),
                          np.asarray(w3), np.asarray(b3), K)
    max_err = float(np.max(np.abs(np.asarray(out, np.float64) - ref)))
    assert max_err < 5e-2, f"max abs err {max_err}"

    print("KERNEL_OK")
</pallas_src>

<mosaic_0001>
module attributes {stable_mosaic.version = 11 : i64} {
  func.func @_convnormpool_kernel(%arg0: memref<4x32xf32, #tpu.memory_space<vmem>>, %arg1: memref<8x12xf32, #tpu.memory_space<vmem>>, %arg2: memref<8x1xf32, #tpu.memory_space<vmem>>, %arg3: memref<8x1xf32, #tpu.memory_space<vmem>>, %arg4: memref<8x24xf32, #tpu.memory_space<vmem>>, %arg5: memref<8x1xf32, #tpu.memory_space<vmem>>, %arg6: memref<8x1xf32, #tpu.memory_space<vmem>>, %arg7: memref<8x24xf32, #tpu.memory_space<vmem>>, %arg8: memref<8x1xf32, #tpu.memory_space<vmem>>, %arg9: memref<8x1xf32, #tpu.memory_space<vmem>>, %arg10: memref<2x8x8xf32, #tpu.memory_space<vmem>>, %arg11: memref<32x8xf32, #tpu.memory_space<vmem>>) attributes {dimension_semantics = [], scalar_prefetch = 0 : i64, scratch_operands = 1 : i64, tpu.core_type = #tpu.core_type<tc>} {
    %0 = tpu.iota {dimensions = array<i32: 1>} : vector<1x32xi32>
    %c16_i32 = arith.constant 16 : i32
    %c0_i32 = arith.constant 0 : i32
    %1 = arith.cmpi eq, %c16_i32, %c0_i32 : i32
    %c1_i32 = arith.constant 1 : i32
    %2 = arith.select %1, %c1_i32, %c16_i32 : i32
    %3 = vector.broadcast %2 : i32 to vector<1x32xi32>
    %4 = arith.remsi %0, %3 : vector<1x32xi32>
    %c0_i32_0 = arith.constant 0 : i32
    %5 = vector.broadcast %c0_i32_0 : i32 to vector<1x32xi32>
    %6 = arith.cmpi ne, %4, %5 : vector<1x32xi32>
    %c0_i32_1 = arith.constant 0 : i32
    %7 = vector.broadcast %c0_i32_1 : i32 to vector<1x32xi32>
    %8 = arith.cmpi slt, %4, %7 : vector<1x32xi32>
    %c0_i32_2 = arith.constant 0 : i32
    %9 = arith.cmpi slt, %2, %c0_i32_2 : i32
    %10 = vector.broadcast %9 : i1 to vector<1x32xi1>
    %11 = vector.broadcast %10 : vector<1x32xi1> to vector<1x32xi1>
    %12 = arith.xori %8, %11 : vector<1x32xi1>
    %13 = arith.andi %12, %6 : vector<1x32xi1>
    %14 = vector.broadcast %2 : i32 to vector<1x32xi32>
    %15 = arith.addi %4, %14 : vector<1x32xi32>
    %16 = arith.select %13, %15, %4 : vector<1x32xi1>, vector<1x32xi32>
    %c2_i32 = arith.constant 2 : i32
    %17 = vector.broadcast %c2_i32 : i32 to vector<1x32xi32>
    %18 = arith.cmpi sge, %16, %17 : vector<1x32xi32>
    %c0 = arith.constant 0 : index
    %c0_3 = arith.constant 0 : index
    %19 = vector.load %arg0[%c0, %c0_3] : memref<4x32xf32, #tpu.memory_space<vmem>>, vector<4x32xf32>
    %cst = arith.constant 0.000000e+00 : f32
    %20 = vector.broadcast %cst : f32 to vector<4x2xf32>
    %21 = vector.extract_strided_slice %19 {offsets = [0, 0], sizes = [4, 30], strides = [1, 1]} : vector<4x32xf32> to vector<4x30xf32>
    %22 = tpu.concatenate %20, %21 in 1 : vector<4x2xf32>, vector<4x30xf32> -> vector<4x32xf32>
    %cst_4 = arith.constant 0.000000e+00 : f32
    %23 = vector.broadcast %cst_4 : f32 to vector<4x1xf32>
    %24 = vector.extract_strided_slice %19 {offsets = [0, 0], sizes = [4, 31], strides = [1, 1]} : vector<4x32xf32> to vector<4x31xf32>
    %25 = tpu.concatenate %23, %24 in 1 : vector<4x1xf32>, vector<4x31xf32> -> vector<4x32xf32>
    %26 = tpu.concatenate %22, %25, %19 in 0 : vector<4x32xf32>, vector<4x32xf32>, vector<4x32xf32> -> vector<12x32xf32>
    %c0_5 = arith.constant 0 : index
    %c0_6 = arith.constant 0 : index
    %27 = vector.load %arg1[%c0_5, %c0_6] : memref<8x12xf32, #tpu.memory_space<vmem>>, vector<8x12xf32>
    %cst_7 = arith.constant dense<0.000000e+00> : vector<8x32xf32>
    %28 = tpu.matmul %27, %26, %cst_7 {dimension_numbers = #tpu.dot_dimension_numbers<[1], [0], [0], [1], [0, 0, 1, 1], [], []>} : vector<8x12xf32>, vector<12x32xf32>, vector<8x32xf32> -> vector<8x32xf32>
    %cst_8 = arith.constant 0.000000e+00 : f32
    %29 = vector.shape_cast %18 : vector<1x32xi1> to vector<1x32xi1>
    %30 = vector.broadcast %29 : vector<1x32xi1> to vector<8x32xi1>
    %31 = vector.broadcast %cst_8 : f32 to vector<8x32xf32>
    %32 = arith.select %30, %28, %31 : vector<8x32xi1>, vector<8x32xf32>
    %cst_9 = arith.constant dense<0.000000e+00> : vector<8xf32>
    %33 = vector.multi_reduction <add>, %32, %cst_9 [1] : vector<8x32xf32> to vector<8xf32>
    %34 = vector.shape_cast %33 : vector<8xf32> to vector<8x1xf32>
    %cst_10 = arith.constant 0.0357142873 : f32
    %35 = vector.broadcast %cst_10 : f32 to vector<8x1xf32>
    %36 = arith.mulf %34, %35 : vector<8x1xf32>
    %37 = vector.broadcast %36 : vector<8x1xf32> to vector<8x32xf32>
    %38 = arith.subf %28, %37 : vector<8x32xf32>
    %cst_11 = arith.constant 0.000000e+00 : f32
    %39 = vector.shape_cast %18 : vector<1x32xi1> to vector<1x32xi1>
    %40 = vector.broadcast %39 : vector<1x32xi1> to vector<8x32xi1>
    %41 = vector.broadcast %cst_11 : f32 to vector<8x32xf32>
    %42 = arith.select %40, %38, %41 : vector<8x32xi1>, vector<8x32xf32>
    %43 = arith.mulf %42, %42 : vector<8x32xf32>
    %cst_12 = arith.constant dense<0.000000e+00> : vector<8xf32>
    %44 = vector.multi_reduction <add>, %43, %cst_12 [1] : vector<8x32xf32> to vector<8xf32>
    %45 = vector.shape_cast %44 : vector<8xf32> to vector<8x1xf32>
    %cst_13 = arith.constant 0.0357142873 : f32
    %46 = vector.broadcast %cst_13 : f32 to vector<8x1xf32>
    %47 = arith.mulf %45, %46 : vector<8x1xf32>
    %c0_14 = arith.constant 0 : index
    %c0_15 = arith.constant 0 : index
    %48 = vector.load %arg2[%c0_14, %c0_15] : memref<8x1xf32, #tpu.memory_space<vmem>>, vector<8x1xf32>
    %cst_16 = arith.constant 9.99999974E-6 : f32
    %49 = vector.broadcast %cst_16 : f32 to vector<8x1xf32>
    %50 = arith.addf %47, %49 : vector<8x1xf32>
    %51 = math.rsqrt %50 : vector<8x1xf32>
    %52 = arith.mulf %48, %51 : vector<8x1xf32>
    %c0_17 = arith.constant 0 : index
    %c0_18 = arith.constant 0 : index
    %53 = vector.load %arg3[%c0_17, %c0_18] : memref<8x1xf32, #tpu.memory_space<vmem>>, vector<8x1xf32>
    %54 = arith.mulf %36, %52 : vector<8x1xf32>
    %55 = arith.subf %53, %54 : vector<8x1xf32>
    %56 = vector.broadcast %52 : vector<8x1xf32> to vector<8x32xf32>
    %57 = arith.mulf %28, %56 : vector<8x32xf32>
    %58 = vector.broadcast %55 : vector<8x1xf32> to vector<8x32xf32>
    %59 = arith.addf %57, %58 : vector<8x32xf32>
    %cst_19 = arith.constant 0.000000e+00 : f32
    %60 = vector.broadcast %cst_19 : f32 to vector<8x32xf32>
    %61 = arith.subf %60, %59 : vector<8x32xf32>
    %62 = math.exp %61 : vector<8x32xf32>
    %cst_20 = arith.constant 1.000000e+00 : f32
    %63 = vector.broadcast %cst_20 : f32 to vector<8x32xf32>
    %64 = arith.addf %63, %62 : vector<8x32xf32>
    %65 = tpu.reciprocal %64 {approx = true} : vector<8x32xf32> -> vector<8x32xf32>
    %66 = arith.mulf %59, %65 : vector<8x32xf32>
    %cst_21 = arith.constant 0.000000e+00 : f32
    %67 = vector.shape_cast %18 : vector<1x32xi1> to vector<1x32xi1>
    %68 = vector.broadcast %67 : vector<1x32xi1> to vector<8x32xi1>
    %69 = vector.broadcast %cst_21 : f32 to vector<8x32xf32>
    %70 = arith.select %68, %66, %69 : vector<8x32xi1>, vector<8x32xf32>
    %cst_22 = arith.constant 0.000000e+00 : f32
    %71 = vector.broadcast %cst_22 : f32 to vector<8x2xf32>
    %72 = vector.extract_strided_slice %70 {offsets = [0, 0], sizes = [8, 30], strides = [1, 1]} : vector<8x32xf32> to vector<8x30xf32>
    %73 = tpu.concatenate %71, %72 in 1 : vector<8x2xf32>, vector<8x30xf32> -> vector<8x32xf32>
    %cst_23 = arith.constant 0.000000e+00 : f32
    %74 = vector.broadcast %cst_23 : f32 to vector<8x1xf32>
    %75 = vector.extract_strided_slice %70 {offsets = [0, 0], sizes = [8, 31], strides = [1, 1]} : vector<8x32xf32> to vector<8x31xf32>
    %76 = tpu.concatenate %74, %75 in 1 : vector<8x1xf32>, vector<8x31xf32> -> vector<8x32xf32>
    %77 = tpu.concatenate %73, %76, %70 in 0 : vector<8x32xf32>, vector<8x32xf32>, vector<8x32xf32> -> vector<24x32xf32>
    %c0_24 = arith.constant 0 : index
    %c0_25 = arith.constant 0 : index
    %78 = vector.load %arg4[%c0_24, %c0_25] : memref<8x24xf32, #tpu.memory_space<vmem>>, vector<8x24xf32>
    %cst_26 = arith.constant dense<0.000000e+00> : vector<8x32xf32>
    %79 = tpu.matmul %78, %77, %cst_26 {dimension_numbers = #tpu.dot_dimension_numbers<[1], [0], [0], [1], [0, 0, 1, 1], [], []>} : vector<8x24xf32>, vector<24x32xf32>, vector<8x32xf32> -> vector<8x32xf32>
    %cst_27 = arith.constant 0.000000e+00 : f32
    %80 = vector.shape_cast %18 : vector<1x32xi1> to vector<1x32xi1>
    %81 = vector.broadcast %80 : vector<1x32xi1> to vector<8x32xi1>
    %82 = vector.broadcast %cst_27 : f32 to vector<8x32xf32>
    %83 = arith.select %81, %79, %82 : vector<8x32xi1>, vector<8x32xf32>
    %cst_28 = arith.constant dense<0.000000e+00> : vector<8xf32>
    %84 = vector.multi_reduction <add>, %83, %cst_28 [1] : vector<8x32xf32> to vector<8xf32>
    %85 = vector.shape_cast %84 : vector<8xf32> to vector<8x1xf32>
    %cst_29 = arith.constant 0.0357142873 : f32
    %86 = vector.broadcast %cst_29 : f32 to vector<8x1xf32>
    %87 = arith.mulf %85, %86 : vector<8x1xf32>
    %88 = vector.broadcast %87 : vector<8x1xf32> to vector<8x32xf32>
    %89 = arith.subf %79, %88 : vector<8x32xf32>
    %cst_30 = arith.constant 0.000000e+00 : f32
    %90 = vector.shape_cast %18 : vector<1x32xi1> to vector<1x32xi1>
    %91 = vector.broadcast %90 : vector<1x32xi1> to vector<8x32xi1>
    %92 = vector.broadcast %cst_30 : f32 to vector<8x32xf32>
    %93 = arith.select %91, %89, %92 : vector<8x32xi1>, vector<8x32xf32>
    %94 = arith.mulf %93, %93 : vector<8x32xf32>
    %cst_31 = arith.constant dense<0.000000e+00> : vector<8xf32>
    %95 = vector.multi_reduction <add>, %94, %cst_31 [1] : vector<8x32xf32> to vector<8xf32>
    %96 = vector.shape_cast %95 : vector<8xf32> to vector<8x1xf32>
    %cst_32 = arith.constant 0.0357142873 : f32
    %97 = vector.broadcast %cst_32 : f32 to vector<8x1xf32>
    %98 = arith.mulf %96, %97 : vector<8x1xf32>
    %c0_33 = arith.constant 0 : index
    %c0_34 = arith.constant 0 : index
    %99 = vector.load %arg5[%c0_33, %c0_34] : memref<8x1xf32, #tpu.memory_space<vmem>>, vector<8x1xf32>
    %cst_35 = arith.constant 9.99999974E-6 : f32
    %100 = vector.broadcast %cst_35 : f32 to vector<8x1xf32>
    %101 = arith.addf %98, %100 : vector<8x1xf32>
    %102 = math.rsqrt %101 : vector<8x1xf32>
    %103 = arith.mulf %99, %102 : vector<8x1xf32>
    %c0_36 = arith.constant 0 : index
    %c0_37 = arith.constant 0 : index
    %104 = vector.load %arg6[%c0_36, %c0_37] : memref<8x1xf32, #tpu.memory_space<vmem>>, vector<8x1xf32>
    %105 = arith.mulf %87, %103 : vector<8x1xf32>
    %106 = arith.subf %104, %105 : vector<8x1xf32>
    %107 = vector.broadcast %103 : vector<8x1xf32> to vector<8x32xf32>
    %108 = arith.mulf %79, %107 : vector<8x32xf32>
    %109 = vector.broadcast %106 : vector<8x1xf32> to vector<8x32xf32>
    %110 = arith.addf %108, %109 : vector<8x32xf32>
    %cst_38 = arith.constant 0.000000e+00 : f32
    %111 = vector.broadcast %cst_38 : f32 to vector<8x32xf32>
    %112 = arith.subf %111, %110 : vector<8x32xf32>
    %113 = math.exp %112 : vector<8x32xf32>
    %cst_39 = arith.constant 1.000000e+00 : f32
    %114 = vector.broadcast %cst_39 : f32 to vector<8x32xf32>
    %115 = arith.addf %114, %113 : vector<8x32xf32>
    %116 = tpu.reciprocal %115 {approx = true} : vector<8x32xf32> -> vector<8x32xf32>
    %117 = arith.mulf %110, %116 : vector<8x32xf32>
    %cst_40 = arith.constant 0.000000e+00 : f32
    %118 = vector.shape_cast %18 : vector<1x32xi1> to vector<1x32xi1>
    %119 = vector.broadcast %118 : vector<1x32xi1> to vector<8x32xi1>
    %120 = vector.broadcast %cst_40 : f32 to vector<8x32xf32>
    %121 = arith.select %119, %117, %120 : vector<8x32xi1>, vector<8x32xf32>
    %cst_41 = arith.constant 0.000000e+00 : f32
    %122 = vector.broadcast %cst_41 : f32 to vector<8x2xf32>
    %123 = vector.extract_strided_slice %121 {offsets = [0, 0], sizes = [8, 30], strides = [1, 1]} : vector<8x32xf32> to vector<8x30xf32>
    %124 = tpu.concatenate %122, %123 in 1 : vector<8x2xf32>, vector<8x30xf32> -> vector<8x32xf32>
    %cst_42 = arith.constant 0.000000e+00 : f32
    %125 = vector.broadcast %cst_42 : f32 to vector<8x1xf32>
    %126 = vector.extract_strided_slice %121 {offsets = [0, 0], sizes = [8, 31], strides = [1, 1]} : vector<8x32xf32> to vector<8x31xf32>
    %127 = tpu.concatenate %125, %126 in 1 : vector<8x1xf32>, vector<8x31xf32> -> vector<8x32xf32>
    %128 = tpu.concatenate %124, %127, %121 in 0 : vector<8x32xf32>, vector<8x32xf32>, vector<8x32xf32> -> vector<24x32xf32>
    %c0_43 = arith.constant 0 : index
    %c0_44 = arith.constant 0 : index
    %129 = vector.load %arg7[%c0_43, %c0_44] : memref<8x24xf32, #tpu.memory_space<vmem>>, vector<8x24xf32>
    %cst_45 = arith.constant dense<0.000000e+00> : vector<8x32xf32>
    %130 = tpu.matmul %129, %128, %cst_45 {dimension_numbers = #tpu.dot_dimension_numbers<[1], [0], [0], [1], [0, 0, 1, 1], [], []>} : vector<8x24xf32>, vector<24x32xf32>, vector<8x32xf32> -> vector<8x32xf32>
    %131 = arith.addf %28, %130 : vector<8x32xf32>
    %cst_46 = arith.constant 0.000000e+00 : f32
    %132 = vector.shape_cast %18 : vector<1x32xi1> to vector<1x32xi1>
    %133 = vector.broadcast %132 : vector<1x32xi1> to vector<8x32xi1>
    %134 = vector.broadcast %cst_46 : f32 to vector<8x32xf32>
    %135 = arith.select %133, %131, %134 : vector<8x32xi1>, vector<8x32xf32>
    %cst_47 = arith.constant dense<0.000000e+00> : vector<8xf32>
    %136 = vector.multi_reduction <add>, %135, %cst_47 [1] : vector<8x32xf32> to vector<8xf32>
    %137 = vector.shape_cast %136 : vector<8xf32> to vector<8x1xf32>
    %cst_48 = arith.constant 0.0357142873 : f32
    %138 = vector.broadcast %cst_48 : f32 to vector<8x1xf32>
    %139 = arith.mulf %137, %138 : vector<8x1xf32>
    %140 = vector.broadcast %139 : vector<8x1xf32> to vector<8x32xf32>
    %141 = arith.subf %131, %140 : vector<8x32xf32>
    %cst_49 = arith.constant 0.000000e+00 : f32
    %142 = vector.shape_cast %18 : vector<1x32xi1> to vector<1x32xi1>
    %143 = vector.broadcast %142 : vector<1x32xi1> to vector<8x32xi1>
    %144 = vector.broadcast %cst_49 : f32 to vector<8x32xf32>
    %145 = arith.select %143, %141, %144 : vector<8x32xi1>, vector<8x32xf32>
    %146 = arith.mulf %145, %145 : vector<8x32xf32>
    %cst_50 = arith.constant dense<0.000000e+00> : vector<8xf32>
    %147 = vector.multi_reduction <add>, %146, %cst_50 [1] : vector<8x32xf32> to vector<8xf32>
    %148 = vector.shape_cast %147 : vector<8xf32> to vector<8x1xf32>
    %cst_51 = arith.constant 0.0357142873 : f32
    %149 = vector.broadcast %cst_51 : f32 to vector<8x1xf32>
    %150 = arith.mulf %148, %149 : vector<8x1xf32>
    %c0_52 = arith.constant 0 : index
    %c0_53 = arith.constant 0 : index
    %151 = vector.load %arg8[%c0_52, %c0_53] : memref<8x1xf32, #tpu.memory_space<vmem>>, vector<8x1xf32>
    %cst_54 = arith.constant 9.99999974E-6 : f32
    %152 = vector.broadcast %cst_54 : f32 to vector<8x1xf32>
    %153 = arith.addf %150, %152 : vector<8x1xf32>
    %154 = math.rsqrt %153 : vector<8x1xf32>
    %155 = arith.mulf %151, %154 : vector<8x1xf32>
    %c0_55 = arith.constant 0 : index
    %c0_56 = arith.constant 0 : index
    %156 = vector.load %arg9[%c0_55, %c0_56] : memref<8x1xf32, #tpu.memory_space<vmem>>, vector<8x1xf32>
    %157 = arith.mulf %139, %155 : vector<8x1xf32>
    %158 = arith.subf %156, %157 : vector<8x1xf32>
    %159 = vector.broadcast %155 : vector<8x1xf32> to vector<8x32xf32>
    %160 = arith.mulf %131, %159 : vector<8x32xf32>
    %161 = vector.broadcast %158 : vector<8x1xf32> to vector<8x32xf32>
    %162 = arith.addf %160, %161 : vector<8x32xf32>
    %cst_57 = arith.constant 0.000000e+00 : f32
    %163 = vector.broadcast %cst_57 : f32 to vector<8x32xf32>
    %164 = arith.subf %163, %162 : vector<8x32xf32>
    %165 = math.exp %164 : vector<8x32xf32>
    %cst_58 = arith.constant 1.000000e+00 : f32
    %166 = vector.broadcast %cst_58 : f32 to vector<8x32xf32>
    %167 = arith.addf %166, %165 : vector<8x32xf32>
    %168 = tpu.reciprocal %167 {approx = true} : vector<8x32xf32> -> vector<8x32xf32>
    %169 = arith.mulf %162, %168 : vector<8x32xf32>
    %cst_59 = arith.constant 0.000000e+00 : f32
    %170 = vector.shape_cast %18 : vector<1x32xi1> to vector<1x32xi1>
    %171 = vector.broadcast %170 : vector<1x32xi1> to vector<8x32xi1>
    %172 = vector.broadcast %cst_59 : f32 to vector<8x32xf32>
    %173 = arith.select %171, %169, %172 : vector<8x32xi1>, vector<8x32xf32>
    %174 = tpu.transpose %173, [1, 0] : vector<8x32xf32> -> vector<32x8xf32>
    %c0_60 = arith.constant 0 : index
    %c0_61 = arith.constant 0 : index
    %175 = vector.load %arg11[%c0_60, %c0_61] : memref<32x8xf32, #tpu.memory_space<vmem>>, vector<32x8xf32>
    tpu.vector_store %arg11[%c0_60, %c0_61], %174 {strides = array<i32>} : memref<32x8xf32, #tpu.memory_space<vmem>>, vector<32x8xf32>,
    %c0_62 = arith.constant 0 : index
    %c0_63 = arith.constant 0 : index
    %176 = tpu.strided_load %arg11[%c0_62, %c0_63] {strides = array<i32: 2, 1>} : memref<32x8xf32, #tpu.memory_space<vmem>>, vector<16x8xf32>
    %c1 = arith.constant 1 : index
    %c0_64 = arith.constant 0 : index
    %177 = tpu.strided_load %arg11[%c1, %c0_64] {strides = array<i32: 2, 1>} : memref<32x8xf32, #tpu.memory_space<vmem>>, vector<16x8xf32>
    %178 = arith.maximumf %176, %177 : vector<16x8xf32>
    %179 = tpu.transpose %178, [1, 0] : vector<16x8xf32> -> vector<8x16xf32>
    %180 = vector.extract_strided_slice %179 {offsets = [0, 0], sizes = [8, 8], strides = [1, 1]} : vector<8x16xf32> to vector<8x8xf32>
    %c0_65 = arith.constant 0 : index
    %c0_66 = arith.constant 0 : index
    %c0_67 = arith.constant 0 : index
    %181 = vector.load %arg10[%c0_65, %c0_66, %c0_67] : memref<2x8x8xf32, #tpu.memory_space<vmem>>, vector<1x8x8xf32>
    %182 = vector.shape_cast %181 : vector<1x8x8xf32> to vector<8x8xf32>
    %183 = vector.shape_cast %180 : vector<8x8xf32> to vector<1x8x8xf32>
    tpu.vector_store %arg10[%c0_65, %c0_66, %c0_67], %183 {strides = array<i32>} : memref<2x8x8xf32, #tpu.memory_space<vmem>>, vector<1x8x8xf32>,
    %184 = vector.extract_strided_slice %179 {offsets = [0, 8], sizes = [8, 8], strides = [1, 1]} : vector<8x16xf32> to vector<8x8xf32>
    %c1_68 = arith.constant 1 : index
    %c0_69 = arith.constant 0 : index
    %c0_70 = arith.constant 0 : index
    %185 = vector.load %arg10[%c1_68, %c0_69, %c0_70] : memref<2x8x8xf32, #tpu.memory_space<vmem>>, vector<1x8x8xf32>
    %186 = vector.shape_cast %185 : vector<1x8x8xf32> to vector<8x8xf32>
    %187 = vector.shape_cast %184 : vector<8x8xf32> to vector<1x8x8xf32>
    tpu.vector_store %arg10[%c1_68, %c0_69, %c0_70], %187 {strides = array<i32>} : memref<2x8x8xf32, #tpu.memory_space<vmem>>, vector<1x8x8xf32>,
    return
  }
}

</mosaic_0001>

<bundles_post_ra>
// kernel: tpu_custom_call.1
= control target key start
LH: loop header
LB: loop body
LE: loop exit
PB: predicated region body
PF: predicated region fallthrough
CT: control target
= control target key end

     0   :  { %s648_s15 = smov 1   ;;  %v649_v1 = vmov 0.0|0.0   ;;  %vm650_vm0 = vmmov 0   ;;  %v651_v2 = vmov 0.0   ;;  %s842_s0 = inlined_call_operand.vmem [shape: f32[4,32], index: 0, kind: input, shape index: {}]   ;;  %s843_s1 = inlined_call_operand.vmem [shape: f32[8,12], index: 1, kind: input, shape index: {}]   ;;  %s844_s2 = inlined_call_operand.vmem [shape: f32[8,1], index: 2, kind: input, shape index: {}]   ;;  %s845_s3 = inlined_call_operand.vmem [shape: f32[8,1], index: 3, kind: input, shape index: {}]   ;;  %s846_s4 = inlined_call_operand.vmem [shape: f32[8,24], index: 4, kind: input, shape index: {}]   ;;  %s847_s5 = inlined_call_operand.vmem [shape: f32[8,1], index: 5, kind: input, shape index: {}]   ;;  %s848_s6 = inlined_call_operand.vmem [shape: f32[8,1], index: 6, kind: input, shape index: {}]   ;;  %s849_s7 = inlined_call_operand.vmem [shape: f32[8,24], index: 7, kind: input, shape index: {}]   ;;  %s850_s8 = inlined_call_operand.vmem [shape: f32[8,1], index: 8, kind: input, shape index: {}]   ;;  %s851_s9 = inlined_call_operand.vmem [shape: f32[8,1], index: 9, kind: input, shape index: {}]   ;;  %s852_s10 = inlined_call_operand.hbm [shape: f32[2,8,8], index: 10, kind: output, shape index: {}]  }
   0x1   :  { %v51_v0 = vld [vmem:[%s842_s0] sm:$0xf]  ;;  %581 = vmatprep.subr.bf16.mxu0 %v649_v1  ;;  %585 = vmatprep.subr.bf16.mxu1 %v649_v1 }
   0x2   :  { %58 = vrot.lane.b32.xlu0 %v51_v0, %s648_s15  ;;  %560 = vmatprep.mubr.msk.f32.mxu0 %vm650_vm0, %v651_v2 }
   0x3   :  { %569 = vmatprep.mubr.msk.f32.mxu1 %vm650_vm0, %v651_v2 }
   0x4   :  { %15 = vsyncpa [#allocation4], 0  ;;  %s652_s16 = smov 2   ;;  %vm61_vm1 = vcmask 7168   ;;  %vm56_vm2 = vcmask 15360   ;;  %vm66_vm3 = vcmask 1043456   ;;  %v36_v11 = vlaneseq }
   0x5   :  { %vm653_vm4 = vmmov 1   ;;  %v68_v10 = vld [vmem:[%s843_s1] sm:$0xff]  ;;  %vm69_vm6 = vcmask 97280   ;;  %vm148_vm8 = vcmask 261120   ;;  %v654_v25 = vmov 0   ;;  %vm756_vm9 = vmneg %vm61_vm1 }
   0x6   :  { %53 = vrot.lane.b32.xlu0 %v51_v0, %s652_s16  ;;  %vm583_vm5 = vmpackc.low %vm66_vm3, %vm653_vm4  ;;  %v37_v12 = vand.u32 127, %v36_v11  ;;  %605 = vset.pattern.permute.xlu1 %v654_v25  ;;  %v160_v29 = vld [vmem:[%s844_s2] sm:$0xff]  ;;  %vm196_vm12 = vcmask 195584   ;;  %vm462_vm13 = vcmask 64512  }
   0x7   :  { %604 = vset.pattern.permute.xlu0 %v654_v25  ;;  %v164_v32 = vld [vmem:[%s845_s3] sm:$0xff]  ;;  %vm761_vm10 = vmneg %vm56_vm2 }
   0x8   :  { %v42_v13 = vand.u32 15, %v37_v12  ;;  %vm587_vm11 = vmpackc.low %vm756_vm9, %vm761_vm10  ;;  %v195_v51 = vld [vmem:[%s846_s4] sm:$0xff] }
   0xa   :  { %vm730_vm7 = vcmp.ge.s32.totalorder %v42_v13, 2 }
  0x74   :  { %v59_v3 = vpop.permute.xlu0 %58 }
  0x75   :  { %v62_v4 = vsel %vm61_vm1, 0.0, %v59_v3 }
  0x76   :  { %v64_v5 = vrot.slane %v62_v4, 4 }
  0x78   :  { %v54_v6 = vpop.permute.xlu0 %53 }
  0x79   :  { %v57_v7 = vsel %vm56_vm2, 0.0, %v54_v6 }
  0x7a   :  { %v67_v8 = vsel %vm66_vm3, %v57_v7, %v64_v5  ;;  %v286_v5 = vld [vmem:[%s848_s6] sm:$0xff] }
  0x7b   :  { %v582_v9 = vpack.c.bf16 %v51_v0, %v67_v8 }
  0x7d   :  { %584 = vmatpush3.bf16.msk.msra.mxu0 %vm583_vm5, %v582_v9 }
  0x7e   :  { %589 = vmatprep.subr.bf16.mxu0 %v649_v1  ;;  %v282_v1 = vld [vmem:[%s847_s5] sm:$0xff] }
  0x80   :  { %561 = vmatmul.mubr.msk.f32.vlgmr.msra.gmra.mrb[0].mxu0 %vm69_vm6, %v68_v10 }
  0x81   :  { %578 = vmatprep.mubr.msk.f32.mxu0 %vm650_vm0, %v651_v2 }
 0x153   :  { %v734_v15 = vpop.f32.mrb[0].mxu0 }
 0x154   :  { %v562_v16 = vpop.f32.mrb[1].mxu0  ;;  %v147_v17 = vsel %vm730_vm7, %v734_v15, 0.0 }
 0x155   :  { %v149_v18 = vsel %vm148_vm8, %v147_v17, 0.0 }
 0x156   :  { %150 = vadd.xlane.f32.xlu1 %v149_v18 }
 0x1e3   :  { %v151_v19 = vpop.xlane.xlu1 %150 }
 0x1e4   :  { %v152_v20 = vmul.f32 0.035714287, %v151_v19 }
 0x1e6   :  { %v153_v21 = vsub.f32 %v734_v15, %v152_v20 }
 0x1e8   :  { %v154_v22 = vsel %vm730_vm7, %v153_v21, 0.0 }
 0x1e9   :  { %v155_v23 = vmul.f32 %v154_v22, %v154_v22 }
 0x1eb   :  { %v156_v24 = vsel %vm148_vm8, %v155_v23, 0.0 }
 0x1ec   :  { %157 = vadd.xlane.f32.xlu1 %v156_v24  ;;  %v317_v24 = vld [vmem:[%s849_s7] sm:$0xff] }
 0x279   :  { %v158_v26 = vpop.xlane.xlu1 %157 }
 0x27a   :  { %v159_v27 = vmul.f32 0.035714287, %v158_v26 }
 0x27c   :  { %v161_v28 = vadd.f32 1e-05, %v159_v27 }
 0x27e   :  { %606 = vrsqrt.f32 %v161_v28 }
 0x288   :  { %v607_v30 = vpop.eup %606 }
 0x289   :  { %v163_v31 = vmul.f32 %v607_v30, %v160_v29 }
 0x28b   :  { %169 = vperm.xlu0 %604, %v163_v31   ;;  %v165_v33 = vmul.f32 %v163_v31, %v152_v20 }
 0x28d   :  { %v166_v34 = vsub.f32 %v164_v32, %v165_v33 }
 0x28f   :  { %175 = vperm.xlu1 %605, %v166_v34  }
 0x30a   :  { %v170_v35 = vpop.permute.xlu0 %169 }
 0x30b   :  { %v172_v36 = vmul.f32 %v170_v35, %v734_v15 }
 0x30e   :  { %v176_v37 = vpop.permute.xlu1 %175 }
 0x30f   :  { %v178_v38 = vadd.f32 %v176_v37, %v172_v36  ;;  %v404_v37 = vld [vmem:[%s850_s8] sm:$0xff]  ;;  %s655_s8 = smov 120  }
 0x311   :  { %v179_v39 = vsub.f32 0.0, %v178_v38 }
 0x313   :  { %v180_v40 = vmul.f32 1.442695, %v179_v39 }
 0x315   :  { %608 = vpow2.f32 %v180_v40  ;;  %v408_v40 = vld [vmem:[%s851_s9] sm:$0xff]  ;;  %s656_s9 = smov [#allocation3]  }
 0x316   :  { %s520_s27 = sshll.u32 %s656_s9, 4  ;;  %s521_s27 = int_to_ptr.vmem [resolvable:$true] %s520_s27 }
 0x317   :  { %s624_s28 = scalar_lea.vmem %s521_s27, 256  ;;  %p629_p1 = scmp.lt.s32.totalorder %s521_s27, %s521_s27 }
 0x318   :  { %p625_p0 = scmp.ne.s32.totalorder %s521_s27, %s624_s28  ;;  %p630_p2 = scmp.lt.s32.totalorder %s624_s28, %s624_s28 }
 0x31a   :  { %p631_p3 = por %p630_p2, %p629_p1 }
 0x31c   :  { %p632_p4 = pnand %p631_p3, %p625_p0 }
 0x31f   :  { %v609_v41 = vpop.eup %608 }
 0x320   :  { %v182_v42 = vadd.f32 1.0, %v609_v41 }
 0x322   :  { %610 = vrcp.f32 %v182_v42 }
 0x32c   :  { %v611_v43 = vpop.eup %610 }
 0x32d   :  { %v184_v44 = vmul.f32 %v611_v43, %v178_v38 }
 0x32f   :  { %v185_v45 = vsel %vm730_vm7, %v184_v44, 0.0 }
 0x330   :  { %187 = vrot.lane.b32.xlu0 %v185_v45, %s652_s16 }
 0x334   :  { %191 = vrot.lane.b32.xlu0 %v185_v45, %s648_s15 }
 0x3a2   :  { %v188_v47 = vpop.permute.xlu0 %187 }
 0x3a6   :  { %v192_v49 = vpop.permute.xlu0 %191 }
 0x3a7   :  { %v586_v50 = vpack.c.bf16 %v192_v49, %v188_v47 }
 0x3a9   :  { %588 = vmatpush3.bf16.msk.msra.mxu1 %vm587_vm11, %v586_v50 }
 0x3aa   :  { %567 = vmatprep.subr.mxu1 %v651_v2 }
 0x3ad   :  { %568 = vmatpush3.msk.msra.mxu1 %vm730_vm7, %v184_v44 }
 0x3ae   :  { %570 = vmatmul.mubr.msk.f32.vlgmr.msra.gmra.mrb[0].mxu1 %vm196_vm12, %v195_v51 }
 0x481   :  { %v266_v52 = vpop.f32.mrb[0].mxu1 }
 0x482   :  { %v571_v53 = vpop.f32.mrb[1].mxu1  ;;  %v270_v54 = vsel %vm730_vm7, %v266_v52, 0.0 }
 0x483   :  { %v271_v55 = vsel %vm148_vm8, %v270_v54, 0.0 }
 0x484   :  { %272 = vadd.xlane.f32.xlu0 %v271_v55 }
 0x511   :  { %v273_v56 = vpop.xlane.xlu0 %272 }
 0x512   :  { %v274_v57 = vmul.f32 0.035714287, %v273_v56 }
 0x514   :  { %v275_v58 = vsub.f32 %v266_v52, %v274_v57 }
 0x516   :  { %v276_v59 = vsel %vm730_vm7, %v275_v58, 0.0 }
 0x517   :  { %v277_v60 = vmul.f32 %v276_v59, %v276_v59 }
 0x519   :  { %v278_v61 = vsel %vm148_vm8, %v277_v60, 0.0 }
 0x51a   :  { %279 = vadd.xlane.f32.xlu1 %v278_v61 }
 0x5a7   :  { %v280_v62 = vpop.xlane.xlu1 %279 }
 0x5a8   :  { %v281_v63 = vmul.f32 0.035714287, %v280_v62 }
 0x5aa   :  { %v283_v0 = vadd.f32 1e-05, %v281_v63 }
 0x5ac   :  { %612 = vrsqrt.f32 %v283_v0 }
 0x5b6   :  { %v613_v3 = vpop.eup %612 }
 0x5b7   :  { %v285_v4 = vmul.f32 %v613_v3, %v282_v1 }
 0x5b9   :  { %291 = vperm.xlu0 %604, %v285_v4   ;;  %v287_v6 = vmul.f32 %v285_v4, %v274_v57 }
 0x5bb   :  { %v288_v7 = vsub.f32 %v286_v5, %v287_v6 }
 0x5bd   :  { %297 = vperm.xlu1 %605, %v288_v7  }
 0x638   :  { %v292_v8 = vpop.permute.xlu0 %291 }
 0x639   :  { %v294_v9 = vmul.f32 %v292_v8, %v266_v52 }
 0x63c   :  { %v298_v10 = vpop.permute.xlu1 %297 }
 0x63d   :  { %v300_v11 = vadd.f32 %v298_v10, %v294_v9 }
 0x63f   :  { %v301_v12 = vsub.f32 0.0, %v300_v11 }
 0x641   :  { %v302_v13 = vmul.f32 1.442695, %v301_v12 }
 0x643   :  { %614 = vpow2.f32 %v302_v13 }
 0x64d   :  { %v615_v16 = vpop.eup %614 }
 0x64e   :  { %v304_v17 = vadd.f32 1.0, %v615_v16 }
 0x650   :  { %616 = vrcp.f32 %v304_v17 }
 0x65a   :  { %v617_v18 = vpop.eup %616 }
 0x65b   :  { %v306_v19 = vmul.f32 %v617_v18, %v300_v11 }
 0x65d   :  { %v307_v20 = vsel %vm730_vm7, %v306_v19, 0.0 }
 0x65e   :  { %313 = vrot.lane.b32.xlu1 %v307_v20, %s648_s15  ;;  %309 = vrot.lane.b32.xlu0 %v307_v20, %s652_s16 }
 0x6d0   :  { %v314_v21 = vpop.permute.xlu1 %313  ;;  %v310_v22 = vpop.permute.xlu0 %309 }
 0x6d1   :  { %v590_v23 = vpack.c.bf16 %v314_v21, %v310_v22 }
 0x6d3   :  { %592 = vmatpush3.bf16.msk.msra.mxu0 %vm587_vm11, %v590_v23 }
 0x6d4   :  { %576 = vmatprep.subr.mxu0 %v651_v2 }
 0x6d7   :  { %577 = vmatpush3.msk.msra.mxu0 %vm730_vm7, %v306_v19 }
 0x6d8   :  { %579 = vmatmul.mubr.msk.f32.vlgmr.msra.gmra.mrb[2].mxu0 %vm196_vm12, %v317_v24 }
 0x7ab   :  { %v387_v25 = vpop.f32.mrb[2].mxu0 }
 0x7ac   :  { %v391_v26 = vadd.f32 %v387_v25, %v734_v15  ;;  %v580_v27 = vpop.f32.mrb[3].mxu0 }
 0x7ae   :  { %v392_v28 = vsel %vm730_vm7, %v391_v26, 0.0 }
 0x7af   :  { %v393_v29 = vsel %vm148_vm8, %v392_v28, 0.0 }
 0x7b0   :  { %394 = vadd.xlane.f32.xlu0 %v393_v29 }
 0x83d   :  { %v395_v2 = vpop.xlane.xlu0 %394 }
 0x83e   :  { %v396_v30 = vmul.f32 0.035714287, %v395_v2 }
 0x840   :  { %v397_v31 = vsub.f32 %v391_v26, %v396_v30 }
 0x842   :  { %v398_v32 = vsel %vm730_vm7, %v397_v31, 0.0 }
 0x843   :  { %v399_v33 = vmul.f32 %v398_v32, %v398_v32 }
 0x845   :  { %v400_v34 = vsel %vm148_vm8, %v399_v33, 0.0 }
 0x846   :  { %401 = vadd.xlane.f32.xlu1 %v400_v34 }
 0x8d3   :  { %v402_v35 = vpop.xlane.xlu1 %401 }
 0x8d4   :  { %v403_v36 = vmul.f32 0.035714287, %v402_v35 }
 0x8d6   :  { %v405_v15 = vadd.f32 1e-05, %v403_v36 }
 0x8d8   :  { %618 = vrsqrt.f32 %v405_v15 }
 0x8e2   :  { %v619_v38 = vpop.eup %618 }
 0x8e3   :  { %v407_v39 = vmul.f32 %v619_v38, %v404_v37 }
 0x8e5   :  { %413 = vperm.xlu0 %604, %v407_v39   ;;  %v409_v41 = vmul.f32 %v407_v39, %v396_v30 }
 0x8e7   :  { %v410_v42 = vsub.f32 %v408_v40, %v409_v41 }
 0x8e9   :  { %419 = vperm.xlu1 %605, %v410_v42  }
 0x964   :  { %v414_v43 = vpop.permute.xlu0 %413 }
 0x965   :  { %v416_v44 = vmul.f32 %v414_v43, %v391_v26 }
 0x968   :  { %v420_v45 = vpop.permute.xlu1 %419 }
 0x969   :  { %v422_v46 = vadd.f32 %v420_v45, %v416_v44 }
 0x96b   :  { %v423_v47 = vsub.f32 0.0, %v422_v46 }
 0x96d   :  { %v424_v48 = vmul.f32 1.442695, %v423_v47 }
 0x96f   :  { %620 = vpow2.f32 %v424_v48 }
 0x979   :  { %v621_v49 = vpop.eup %620 }
 0x97a   :  { %v426_v50 = vadd.f32 1.0, %v621_v49 }
 0x97c   :  { %622 = vrcp.f32 %v426_v50 }
 0x986   :  { %v623_v51 = vpop.eup %622 }
 0x987   :  { %v428_v52 = vmul.f32 %v623_v51, %v422_v46 }
 0x989   :  { %v429_v53 = vsel %vm730_vm7, %v428_v52, 0.0 }
 0x98a   :  { %430 = vxpose.xlu0.b32.start.end [1/1] (short) (narrow) %v429_v53, 32 }
 0xa0a   :  { %v446_v54 = vpop.trf.xlu0 }
 0xa0b   :  { %463 = vst.msk [vmem:[#allocation2] sm:$0xff] %vm462_vm13, %v446_v54 }
 0xa0e   :  { %v447_v55 = vpop.trf.xlu0 }
 0xa0f   :  { %464 = vst.msk [vmem:[#allocation2 + $0x8] sm:$0xff] %vm462_vm13, %v447_v55 }
 0xa12   :  { %v448_v56 = vpop.trf.xlu0 }
 0xa13   :  { %465 = vst.msk [vmem:[#allocation2 + $0x10] sm:$0xff] %vm462_vm13, %v448_v56 }
 0xa16   :  { %v449_v57 = vpop.trf.xlu0  ;;  %v467_v58 = vld [vmem:[#allocation2] ss:$2 sm:$0xff]  ;;  %v471_v59 = vld [vmem:[#allocation2 + $0x1] ss:$2 sm:$0xff] }
 0xa17   :  { %466 = vst.msk [vmem:[#allocation2 + $0x18] sm:$0xff] %vm462_vm13, %v449_v57  ;;  %v474_v60 = vmax.f32 %v467_v58, %v471_v59 }
 0xa19   :  { %476 = vxpose.xlu1.b32.start [1/2] (short) (narrow) %v474_v60, 8 }
 0xa1e   :  { %v469_v14 = vld [vmem:[#allocation2 + $0x10] ss:$2 sm:$0xff]  ;;  %v473_v61 = vld [vmem:[#allocation2 + $0x11] ss:$2 sm:$0xff] }
 0xa1f   :  { %v475_v62 = vmax.f32 %v469_v14, %v473_v61 }
 0xa21   :  { %477 = vxpose.xlu1.b32.end [2/2] (short) (narrow) %v475_v62, 8 }
 0xa9d   :  { %v492_v63 = vpop.trf.xlu1 }
 0xa9e   :  { %508 = vst.msk [vmem:[#allocation3] sm:$0xff] %vm462_vm13, %v492_v63  ;;  %510 = vrot.lane.b32.xlu0 %v492_v63, %s655_s8 }
 0xb10   :  { %v511_v0 = vpop.permute.xlu0 %510 }
 0xb11   :  { %514 = vst.msk [vmem:[#allocation3 + $0x8] sm:$0xff] %vm462_vm13, %v511_v0 }
 0xb12   :  { %635 = shalt.err (!%p632_p4)
}
 0xb13   :  { %s636_s11 = scalar_lea.hbm %s852_s10, 256 }
 0xb14   :  { %p637_p5 = scmp.ne.s32.totalorder %s852_s10, %s636_s11  ;;  %p640_p6 = scmp.lt.u32.totalorder %s636_s11, %s852_s10 }
 0xb16   :  { %p642_p7 = pnand %p640_p6, %p637_p5 }
 0xb18   :  { %645 = shalt.err (!%p642_p7)
}
 0xb19   :  { %s657_s16 = smov 128   ;;  %s658_s0 = smov 8  }
 0xb1a   :  { %526 = dma.vmem_to_hbm [thread:$0]  %s521_s27, 256, %s852_s10, [#allocation4], %s657_s16, %s657_s16, %s658_s0  }
 0xb1b   :  { %646 = dma.done.wait [#allocation4], 256  }
 0xb1c   :  { %647 = vsyncadd [#allocation4], 4294967040 }
 0xb1d   :  { %530 = vsyncpa [#allocation4], 1 }

</bundles_post_ra>
